<compile_context>
chip_gen: v7x
topology: tpu7x:2x2x1
jax: 0.10.0
libtpu: 0.0.40
codegen_flags: <defaults>
</compile_context>

<pallas_src>
import jax
import jax.numpy as jnp
from jax.experimental import pallas as pl
from jax.experimental.pallas import tpu as pltpu


def _round_up(x, m):
    return ((x + m - 1) // m) * m


def mlp_kernel(x_ref, w1_ref, b1_ref, w2_ref, b2_ref, o_ref):
    # One batch tile: Linear1 -> ReLU -> Linear2; the hidden activation never
    # leaves VMEM.  Matmuls accumulate in f32 on the MXU; bias add and ReLU
    # run in f32 (v5e has no bf16 VPU path).  The cast of x to the compute
    # dtype happens here (no-op for f32), so HBM only ever streams x once.
    x = x_ref[...].astype(w1_ref.dtype)
    h = jnp.dot(x, w1_ref[...], preferred_element_type=jnp.float32) + b1_ref[...]
    h = jnp.maximum(h, 0.0)
    h = h.astype(w2_ref.dtype)  # feed the second MXU pass in the compute dtype
    y = jnp.dot(h, w2_ref[...], preferred_element_type=jnp.float32) + b2_ref[...]
    o_ref[...] = y.astype(o_ref.dtype)


def prepare_params(w1, b1, w2, b2, *, compute_dtype=jnp.float32, hid_pad=128):
    """One-time weight prep: cast to compute dtype, zero-pad hidden dim to 128.

    w1: (input_dim, 32), w2: (32, output_dim) — i.e. transposed vs. PyTorch's
    (out, in) storage; biases 1-D.  Padded hidden columns produce ReLU(0)=0
    and contribute 0 through w2, so the result is exact.
    """
    cd = jnp.dtype(compute_dtype)
    in_dim, hid = w1.shape
    out_dim = w2.shape[1]
    hid_p = _round_up(hid, hid_pad)

    w1p = jnp.zeros((in_dim, hid_p), cd).at[:, :hid].set(jnp.asarray(w1).astype(cd))
    b1p = (jnp.zeros((1, hid_p), jnp.float32)
           .at[:, :hid].set(jnp.asarray(b1).reshape(1, hid).astype(jnp.float32)))
    w2p = jnp.zeros((hid_p, out_dim), cd).at[:hid, :].set(jnp.asarray(w2).astype(cd))
    b2p = jnp.asarray(b2).reshape(1, out_dim).astype(jnp.float32)
    return w1p, b1p, w2p, b2p


def mlp_forward(x, params, *, block_m=4096):
    """y = ReLU(x @ w1 + b1) @ w2 + b2 as one Pallas TPU kernel.

    x: (B, input_dim).  params: output of prepare_params().  Returns f32.
    """
    w1p, b1p, w2p, b2p = params
    B, in_dim = x.shape
    hid_p = w1p.shape[1]
    out_dim = w2p.shape[1]
    cd = jnp.dtype(w1p.dtype)
    assert w1p.shape[0] == in_dim and w2p.shape[0] == hid_p

    # ---- batch tiling ------------------------------------------------------
    # Tile must be a multiple of 8 sublanes (f32 x / f32 out).  Cap it at
    # ceil(B/2) so the grid has >=2 steps whenever possible: with
    # dimension_semantics=("parallel",) that lets v7x's two TensorCores both
    # run.  No wrapper-side padding of x: the ragged last block reads garbage
    # rows that are never stored (rows are independent, no cross-row reduce).
    sub = 8
    half = -(-B // 2)                       # ceil(B / 2)
    tm = max(sub, min(block_m, _round_up(half, sub)))
    grid = (pl.cdiv(B, tm),)

    # ---- VMEM budget: double-buffered x/out tiles + resident weights --------
    vmem_bytes = (
        2 * tm * in_dim * x.dtype.itemsize                    # x tiles
        + 2 * tm * out_dim * 4                                # out tiles (f32)
        + (in_dim * hid_p + hid_p * out_dim) * cd.itemsize    # weights
        + (hid_p + out_dim) * 4                               # biases
        + tm * hid_p * 4                                      # hidden activation
    )
    vmem_limit = int(min(max(2 * vmem_bytes, 16 << 20), 32 << 20))

    # Advisory cost hint reflecting what is actually DMA'd / computed.
    cost = pl.CostEstimate(
        flops=2 * B * (in_dim * hid_p + hid_p * out_dim),
        transcendentals=0,
        bytes_accessed=int(
            B * in_dim * x.dtype.itemsize                     # stream x once
            + B * out_dim * 4                                 # real output bytes
            + (in_dim * hid_p + hid_p * out_dim) * cd.itemsize
            + (hid_p + out_dim) * 4
        ),
    )

    out = pl.pallas_call(
        mlp_kernel,
        out_shape=jax.ShapeDtypeStruct((B, out_dim), jnp.float32),
        grid=grid,
        in_specs=[
            pl.BlockSpec((tm, in_dim), lambda i: (i, 0)),      # streamed x tiles
            pl.BlockSpec((in_dim, hid_p), lambda i: (0, 0)),   # VMEM-resident weights
            pl.BlockSpec((1, hid_p), lambda i: (0, 0)),
            pl.BlockSpec((hid_p, out_dim), lambda i: (0, 0)),
            pl.BlockSpec((1, out_dim), lambda i: (0, 0)),
        ],
        out_specs=pl.BlockSpec((tm, out_dim), lambda i: (i, 0)),
        compiler_params=pltpu.CompilerParams(
            dimension_semantics=("parallel",),
            vmem_limit_bytes=vmem_limit,
        ),
        cost_estimate=cost,
    )(x, w1p, b1p, w2p, b2p)

    return out


def mlp_reference(x, w1, b1, w2, b2, compute_dtype=jnp.float32):
    # Plain-JAX reference mirroring the kernel's dtype handling.
    cd = jnp.dtype(compute_dtype)
    h = jnp.dot(x.astype(cd), jnp.asarray(w1).astype(cd),
                preferred_element_type=jnp.float32)
    h = jnp.maximum(h + jnp.asarray(b1).reshape(1, -1).astype(jnp.float32), 0.0)
    y = jnp.dot(h.astype(cd), jnp.asarray(w2).astype(cd),
                preferred_element_type=jnp.float32)
    return y + jnp.asarray(b2).reshape(1, -1).astype(jnp.float32)


def init_params(key, input_dim, hidden_dim, output_dim):
    # Mimics torch.nn.Linear default init: U[-1/sqrt(fan_in), +1/sqrt(fan_in)].
    k1, k2, k3, k4 = jax.random.split(key, 4)
    bound1 = 1.0 / (input_dim ** 0.5)
    bound2 = 1.0 / (hidden_dim ** 0.5)
    w1 = jax.random.uniform(k1, (input_dim, hidden_dim), jnp.float32, -bound1, bound1)
    b1 = jax.random.uniform(k2, (hidden_dim,), jnp.float32, -bound1, bound1)
    w2 = jax.random.uniform(k3, (hidden_dim, output_dim), jnp.float32, -bound2, bound2)
    b2 = jax.random.uniform(k4, (output_dim,), jnp.float32, -bound2, bound2)
    return w1, b1, w2, b2


if __name__ == "__main__":
    key = jax.random.PRNGKey(0)
    kx, kp = jax.random.split(key)

    batch, input_dim, hidden_dim, output_dim = 8, 16, 32, 4
    x = jax.random.normal(kx, (batch, input_dim), jnp.float32)
    w1, b1, w2, b2 = init_params(kp, input_dim, hidden_dim, output_dim)

    # One-time weight prep (hoisted out of the per-call path).
    params_f32 = prepare_params(w1, b1, w2, b2, compute_dtype=jnp.float32)

    # 1) f32 path, tiny batch (single grid step).
    out = jax.block_until_ready(mlp_forward(x, params_f32))
    ref = mlp_reference(x, w1, b1, w2, b2)
    assert out.shape == (batch, output_dim)
    assert jnp.allclose(out, ref, atol=1e-5, rtol=1e-5)

    # 2) f32 path exercising a multi-step grid with a ragged last block
    #    (B=200, tm=64 -> 4 blocks, last one partial; no wrapper padding).
    x2 = jax.random.normal(jax.random.fold_in(kx, 1), (200, input_dim), jnp.float32)
    out2 = jax.block_until_ready(mlp_forward(x2, params_f32, block_m=64))
    ref2 = mlp_reference(x2, w1, b1, w2, b2)
    assert out2.shape == (200, output_dim)
    assert jnp.allclose(out2, ref2, atol=1e-5, rtol=1e-5)

    # 3) bf16 MXU operands with f32 accumulation (v6e/v7x fast path); the
    #    bf16 cast of x happens inside the kernel, x stays f32 in HBM.
    params_bf16 = prepare_params(w1, b1, w2, b2, compute_dtype=jnp.bfloat16)
    out3 = jax.block_until_ready(mlp_forward(x, params_bf16))
    ref3 = mlp_reference(x, w1, b1, w2, b2, compute_dtype=jnp.bfloat16)
    assert out3.shape == (batch, output_dim)
    assert jnp.allclose(out3, ref3, atol=1e-2, rtol=1e-2)

    print("KERNEL_OK")
</pallas_src>

<mosaic_0001>
module attributes {stable_mosaic.version = 11 : i64} {
  func.func @mlp_kernel(%arg0: i32, %arg1: memref<8x16xf32, #tpu.memory_space<vmem>>, %arg2: memref<16x128xf32, #tpu.memory_space<vmem>>, %arg3: memref<1x128xf32, #tpu.memory_space<vmem>>, %arg4: memref<128x4xf32, #tpu.memory_space<vmem>>, %arg5: memref<1x4xf32, #tpu.memory_space<vmem>>, %arg6: memref<8x4xf32, #tpu.memory_space<vmem>>) attributes {dimension_semantics = [#tpu.dimension_semantics<parallel>], iteration_bounds = array<i64: 1>, scalar_prefetch = 0 : i64, scratch_operands = 0 : i64, tpu.core_type = #tpu.core_type<tc>, window_params = [{transform_indices = @transform_0, window_bounds = array<i64: 8, 16>}, {pipeline_mode = #tpu.pipeline_mode<synchronous>, transform_indices = @transform_1, window_bounds = array<i64: 16, 128>}, {pipeline_mode = #tpu.pipeline_mode<synchronous>, transform_indices = @transform_2, window_bounds = array<i64: 1, 128>}, {pipeline_mode = #tpu.pipeline_mode<synchronous>, transform_indices = @transform_3, window_bounds = array<i64: 128, 4>}, {pipeline_mode = #tpu.pipeline_mode<synchronous>, transform_indices = @transform_4, window_bounds = array<i64: 1, 4>}, {transform_indices = @transform_5, window_bounds = array<i64: 8, 4>}]} {
    %c0 = arith.constant 0 : index
    %c0_0 = arith.constant 0 : index
    %0 = vector.load %arg1[%c0, %c0_0] : memref<8x16xf32, #tpu.memory_space<vmem>>, vector<8x16xf32>
    %c0_1 = arith.constant 0 : index
    %c0_2 = arith.constant 0 : index
    %1 = vector.load %arg2[%c0_1, %c0_2] : memref<16x128xf32, #tpu.memory_space<vmem>>, vector<16x128xf32>
    %cst = arith.constant dense<0.000000e+00> : vector<8x128xf32>
    %2 = tpu.matmul %0, %1, %cst {dimension_numbers = #tpu.dot_dimension_numbers<[1], [0], [0], [1], [0, 0, 1, 1], [], []>} : vector<8x16xf32>, vector<16x128xf32>, vector<8x128xf32> -> vector<8x128xf32>
    %c0_3 = arith.constant 0 : index
    %c0_4 = arith.constant 0 : index
    %3 = vector.load %arg3[%c0_3, %c0_4] : memref<1x128xf32, #tpu.memory_space<vmem>>, vector<1x128xf32>
    %4 = vector.broadcast %3 : vector<1x128xf32> to vector<8x128xf32>
    %5 = arith.addf %2, %4 : vector<8x128xf32>
    %cst_5 = arith.constant 0.000000e+00 : f32
    %6 = vector.broadcast %cst_5 : f32 to vector<8x128xf32>
    %7 = arith.maximumf %5, %6 : vector<8x128xf32>
    %c0_6 = arith.constant 0 : index
    %c0_7 = arith.constant 0 : index
    %8 = vector.load %arg4[%c0_6, %c0_7] : memref<128x4xf32, #tpu.memory_space<vmem>>, vector<128x4xf32>
    %cst_8 = arith.constant dense<0.000000e+00> : vector<8x4xf32>
    %9 = tpu.matmul %7, %8, %cst_8 {dimension_numbers = #tpu.dot_dimension_numbers<[1], [0], [0], [1], [0, 0, 1, 1], [], []>} : vector<8x128xf32>, vector<128x4xf32>, vector<8x4xf32> -> vector<8x4xf32>
    %c0_9 = arith.constant 0 : index
    %c0_10 = arith.constant 0 : index
    %10 = vector.load %arg5[%c0_9, %c0_10] : memref<1x4xf32, #tpu.memory_space<vmem>>, vector<1x4xf32>
    %11 = vector.broadcast %10 : vector<1x4xf32> to vector<8x4xf32>
    %12 = arith.addf %9, %11 : vector<8x4xf32>
    %c0_11 = arith.constant 0 : index
    %c0_12 = arith.constant 0 : index
    %13 = vector.load %arg6[%c0_11, %c0_12] : memref<8x4xf32, #tpu.memory_space<vmem>>, vector<8x4xf32>
    tpu.vector_store %arg6[%c0_11, %c0_12], %12 {strides = array<i32>} : memref<8x4xf32, #tpu.memory_space<vmem>>, vector<8x4xf32>,
    return
  }
  func.func @transform_0(%arg0: i32) -> (i32, i32) {
    %c0_i32 = arith.constant 0 : i32
    %c0_i32_0 = arith.constant 0 : i32
    return %arg0, %c0_i32 : i32, i32
  }
  func.func @transform_1(%arg0: i32) -> (i32, i32) {
    %c0_i32 = arith.constant 0 : i32
    %c0_i32_0 = arith.constant 0 : i32
    %c0_i32_1 = arith.constant 0 : i32
    return %c0_i32, %c0_i32_0 : i32, i32
  }
  func.func @transform_2(%arg0: i32) -> (i32, i32) {
    %c0_i32 = arith.constant 0 : i32
    %c0_i32_0 = arith.constant 0 : i32
    %c0_i32_1 = arith.constant 0 : i32
    return %c0_i32, %c0_i32_0 : i32, i32
  }
  func.func @transform_3(%arg0: i32) -> (i32, i32) {
    %c0_i32 = arith.constant 0 : i32
    %c0_i32_0 = arith.constant 0 : i32
    %c0_i32_1 = arith.constant 0 : i32
    return %c0_i32, %c0_i32_0 : i32, i32
  }
  func.func @transform_4(%arg0: i32) -> (i32, i32) {
    %c0_i32 = arith.constant 0 : i32
    %c0_i32_0 = arith.constant 0 : i32
    %c0_i32_1 = arith.constant 0 : i32
    return %c0_i32, %c0_i32_0 : i32, i32
  }
  func.func @transform_5(%arg0: i32) -> (i32, i32) {
    %c0_i32 = arith.constant 0 : i32
    %c0_i32_0 = arith.constant 0 : i32
    return %arg0, %c0_i32 : i32, i32
  }
}

</mosaic_0001>

<bundles_post_ra>
// kernel: tpu_custom_call.1
= control target key start
LH: loop header
LB: loop body
LE: loop exit
PB: predicated region body
PF: predicated region fallthrough
CT: control target
= control target key end

     0   :  { %v299_v0 = vmov 0.0|0.0   ;;  %vm300_vm0 = vmmov 0   ;;  %v301_v3 = vmov 0.0   ;;  %vm30_vm1 = vcmask 130048   ;;  %s398_s1 = inlined_call_operand.vmem [shape: f32[16,128], index: 1, kind: input, shape index: {}]   ;;  %s399_s3 = inlined_call_operand.vmem [shape: f32[128,4], index: 3, kind: input, shape index: {}]   ;;  %s400_s0 = inlined_call_operand.vmem [shape: f32[8,16], index: 0, kind: input, shape index: {}]   ;;  %s401_s2 = inlined_call_operand.vmem [shape: f32[1,128], index: 2, kind: input, shape index: {}]   ;;  %s402_s4 = inlined_call_operand.vmem [shape: f32[1,4], index: 4, kind: input, shape index: {}]   ;;  %s403_s5 = inlined_call_operand.vmem [shape: f32[8,4], index: 5, kind: output, shape index: {}]  }
   0x1   :  { %269 = vmatprep.subr.bf16.mxu0 %v299_v0  ;;  %v21_v1 = vld [vmem:[%s398_s1] sm:$0xff]  ;;  %v22_v2 = vld [vmem:[%s398_s1 + $0x8] sm:$0xff]  ;;  %231 = vmatprep.mubr.msk.f32.mxu0 %vm300_vm0, %v301_v3  ;;  %v107_v7 = vld [vmem:[%s399_s3 + $0x10] sm:$0xff]  ;;  %vm198_vm2 = vcmask 31744  }
   0x2   :  { %v270_v4 = vpack.c.bf16 %v22_v2, %v21_v1  ;;  %272 = vmatprep.subr.bf16.mxu1 %v299_v0  ;;  %v105_v5 = vld [vmem:[%s399_s3] sm:$0xff]  ;;  %v106_v6 = vld [vmem:[%s399_s3 + $0x8] sm:$0xff]  ;;  %266 = vmatprep.mubr.msk.f32.mxu1 %vm300_vm0, %v301_v3  ;;  %v108_v9 = vld [vmem:[%s399_s3 + $0x18] sm:$0xff] }
   0x3   :  { %v273_v8 = vpack.c.bf16 %v106_v6, %v105_v5  ;;  %v20_v10 = vld [vmem:[%s400_s0] sm:$0xff]  ;;  %v276_v11 = vpack.c.bf16 %v108_v9, %v107_v7  ;;  %v110_v13 = vld [vmem:[%s399_s3 + $0x28] sm:$0xff]  ;;  %v111_v15 = vld [vmem:[%s399_s3 + $0x30] sm:$0xff] }
   0x4   :  { %271 = vmatpush3.bf16.msra.mxu0 %v270_v4  ;;  %v109_v12 = vld [vmem:[%s399_s3 + $0x20] sm:$0xff]  ;;  %v112_v16 = vld [vmem:[%s399_s3 + $0x38] sm:$0xff]  ;;  %v114_v19 = vld [vmem:[%s399_s3 + $0x48] sm:$0xff] }
   0x5   :  { %274 = vmatpush3.bf16.msra.mxu1 %v273_v8  ;;  %v279_v14 = vpack.c.bf16 %v110_v13, %v109_v12  ;;  %v282_v17 = vpack.c.bf16 %v112_v16, %v111_v15  ;;  %v113_v18 = vld [vmem:[%s399_s3 + $0x40] sm:$0xff]  ;;  %v115_v21 = vld [vmem:[%s399_s3 + $0x50] sm:$0xff]  ;;  %v116_v22 = vld [vmem:[%s399_s3 + $0x58] sm:$0xff] }
   0x6   :  { %275 = vmatprep.subr.bf16.mxu1 %v299_v0  ;;  %v285_v20 = vpack.c.bf16 %v114_v19, %v113_v18  ;;  %v288_v23 = vpack.c.bf16 %v116_v22, %v115_v21  ;;  %v117_v24 = vld [vmem:[%s399_s3 + $0x60] sm:$0xff]  ;;  %v118_v25 = vld [vmem:[%s399_s3 + $0x68] sm:$0xff]  ;;  %v119_v27 = vld [vmem:[%s399_s3 + $0x70] sm:$0xff] }
   0x7   :  { %232 = vmatmul.mubr.msk.f32.vlgmr.msra.gmra.mrb[0].mxu0 %vm30_vm1, %v20_v10  ;;  %v291_v26 = vpack.c.bf16 %v118_v25, %v117_v24  ;;  %v120_v28 = vld [vmem:[%s399_s3 + $0x78] sm:$0xff]  ;;  %v204_v30 = vld [vmem:[%s401_s2] ss:$0 sm:$0xff] }
   0x8   :  { %v294_v29 = vpack.c.bf16 %v120_v28, %v119_v27  ;;  %v206_v35 = vld [vmem:[%s402_s4] ss:$0 sm:$0xff] }
   0x9   :  { %277 = vmatpush3.bf16.msra.mxu1 %v276_v11 }
   0xa   :  { %278 = vmatprep.subr.bf16.mxu1 %v299_v0 }
   0xd   :  { %280 = vmatpush3.bf16.msra.mxu1 %v279_v14 }
   0xe   :  { %281 = vmatprep.subr.bf16.mxu1 %v299_v0 }
  0x11   :  { %283 = vmatpush3.bf16.msra.mxu1 %v282_v17 }
  0x12   :  { %284 = vmatprep.subr.bf16.mxu1 %v299_v0 }
  0x15   :  { %286 = vmatpush3.bf16.msra.mxu1 %v285_v20 }
  0x16   :  { %287 = vmatprep.subr.bf16.mxu1 %v299_v0 }
  0x19   :  { %289 = vmatpush3.bf16.msra.mxu1 %v288_v23 }
  0x1a   :  { %290 = vmatprep.subr.bf16.mxu1 %v299_v0 }
  0x1d   :  { %292 = vmatpush3.bf16.msra.mxu1 %v291_v26 }
  0x1e   :  { %293 = vmatprep.subr.bf16.mxu1 %v299_v0 }
  0x21   :  { %295 = vmatpush3.bf16.msra.mxu1 %v294_v29 }
  0xda   :  { %v100_v31 = vpop.f32.mrb[0].mxu0 }
  0xdb   :  { %v101_v32 = vadd.f32 %v204_v30, %v100_v31  ;;  %v233_v33 = vpop.f32.mrb[1].mxu0 }
  0xdd   :  { %v104_v34 = vmax.f32 %v101_v32, 0.0 }
  0xdf   :  { %267 = vmatmul.mubr.f32.vlgmr.msra.gmra.mrb[0].mxu1 %v104_v34 }
 0x1b2   :  { %v194_v36 = vpop.f32.mrb[0].mxu1 }
 0x1b3   :  { %v195_v37 = vadd.f32 %v206_v35, %v194_v36  ;;  %v268_v38 = vpop.f32.mrb[1].mxu1 }
 0x1b5   :  { %199 = vst.msk [vmem:[%s403_s5] sm:$0xff] %vm198_vm2, %v195_v37 }

</bundles_post_ra>
